<compile_context>
chip_gen: v7x
topology: tpu7x:2x2x1
jax: 0.10.0
libtpu: 0.0.40
codegen_flags: <defaults>
</compile_context>

<pallas_src>
import functools

import numpy as np
import jax
import jax.numpy as jnp
from jax.experimental import pallas as pl
from jax.experimental.pallas import tpu as pltpu


def _distill_kernel(inv_temp_ref, student_ref, teacher_ref, out_ref,
                    q_scratch, acc_scratch, *, n_chunks, ncrops,
                    inv_student_temp):
    """One grid step = (row tile r, student crop v); both teacher chunks are
    handled inside the step using the cached softmax in q_scratch."""
    v = pl.program_id(1)

    @pl.when(v == 0)
    def _init_tile():
        # Fresh per-row accumulator for this row tile.
        acc_scratch[...] = jnp.zeros_like(acc_scratch)
        # Teacher softmax for ALL chunks, once per row tile (detach() is
        # implicit in a forward-only kernel).
        t = teacher_ref[...].astype(jnp.float32) * inv_temp_ref[0]
        t = t - jnp.max(t, axis=-1, keepdims=True)
        et = jnp.exp(t)
        inv_norm = pl.reciprocal(jnp.sum(et, axis=-1, keepdims=True),
                                 approx=True)
        q_scratch[...] = (et * inv_norm).astype(q_scratch.dtype)

    # Student: scaled logits + row logsumexp (single pass per student block).
    s = student_ref[...].astype(jnp.float32) * jnp.float32(inv_student_temp)
    m = jnp.max(s, axis=-1, keepdims=True)
    lse = m + jnp.log(jnp.sum(jnp.exp(s - m), axis=-1, keepdims=True))

    # sum_d -q*(s - lse) = lse - sum_d(q*s)   (since sum_d q == 1)
    ce = jnp.float32(n_chunks) * lse                     # (row_tile, 1)
    for c in range(n_chunks):                            # static unroll (1 or 2)
        ce = ce - jnp.sum(q_scratch[c].astype(jnp.float32) * s,
                          axis=-1, keepdims=True)
    acc_scratch[...] += ce

    # Write the (narrow) output block once per row tile only.
    @pl.when(v == ncrops - 1)
    def _write():
        out_ref[...] = acc_scratch[...]


def _vmem_capacity_bytes():
    """Best-effort physical-VMEM query; falls back to the smallest known
    generation (v7x, 64 MiB) so the budget is always safe."""
    try:
        info = pltpu.get_tpu_info()
        for attr in ("vmem_capacity_bytes", "vmem_size_bytes", "vmem_bytes"):
            val = getattr(info, attr, None)
            if val:
                return int(val)
    except Exception:
        pass
    return 64 * 2**20


def _choose_row_tile(B, per_row_bytes, target_bytes, prefer_split=True):
    """Largest row tile that divides B, is a multiple of 8, keeps per-tile
    VMEM residency under target_bytes, and (when possible) leaves >= 2 row
    tiles so the 'parallel' axis can shard across v7x's two TensorCores."""
    if B % 8 != 0:
        return B          # only legal when the tile spans the full dimension
    cands = [t for t in range(8, B + 1, 8) if B % t == 0]
    if prefer_split:
        split = [t for t in cands if t <= B // 2]
        if split:
            cands = split
    best = cands[0]
    for t in cands:
        if t * per_row_bytes <= target_bytes:
            best = t
    return best


class DistillLossV2:
    """JAX/Pallas port of the PyTorch DistillLossV2 forward pass."""

    def __init__(self, warmup_teacher_temp_epochs, nepochs, ncrops=2,
                 warmup_teacher_temp=0.07, teacher_temp=0.04, student_temp=0.1):
        self.student_temp = student_temp
        self.ncrops = ncrops
        self.teacher_temp_schedule = np.concatenate((
            np.linspace(warmup_teacher_temp, teacher_temp,
                        warmup_teacher_temp_epochs),
            np.ones(nepochs - warmup_teacher_temp_epochs) * teacher_temp,
        )).astype(np.float32)

    def __call__(self, student_output, teacher_output, epoch, row_tile=None,
                 q_dtype=jnp.float32):
        n_chunks = 1 if self.ncrops == 1 else 2
        total_rows_s, D = student_output.shape
        B = total_rows_s // self.ncrops
        assert total_rows_s == self.ncrops * B
        assert teacher_output.shape == (n_chunks * B, D)
        if self.ncrops > 1:
            assert B % 8 == 0, "per-crop batch must be a multiple of 8 on TPU"

        s_bytes = student_output.dtype.itemsize
        t_bytes = teacher_output.dtype.itemsize
        q_bytes = np.dtype(q_dtype).itemsize

        # Per-row residency: 2 student pipeline bufs + 2*n_chunks teacher bufs
        # + n_chunks q-scratch + ~2 f32 compute temporaries per row.
        per_row_bytes = D * (2 * s_bytes + 2 * n_chunks * t_bytes
                             + n_chunks * q_bytes + 8)

        vmem_cap = _vmem_capacity_bytes()
        if vmem_cap >= 100 * 2**20:          # v5e / v6e: 128 MiB physical VMEM
            resid_target, vmem_limit_cap = 40 * 2**20, 64 * 2**20
        else:                                # v7x: 64 MiB physical VMEM
            resid_target, vmem_limit_cap = 20 * 2**20, 40 * 2**20

        if row_tile is None:
            row_tile = _choose_row_tile(B, per_row_bytes, resid_target)
        assert B % row_tile == 0 and (row_tile % 8 == 0 or row_tile == B)
        num_row_tiles = B // row_tile
        n_terms = n_chunks * self.ncrops

        resident = row_tile * per_row_bytes
        vmem_limit = int(min(vmem_limit_cap,
                             max(16 * 2**20,
                                 resident + resident // 2 + (2 << 20))))

        # 1/teacher_temp from the host: multiply instead of divide in-kernel.
        inv_temp = jnp.asarray(
            [1.0 / float(self.teacher_temp_schedule[epoch])], dtype=jnp.float32)

        # Teacher chunks stacked so one resident block covers both per tile.
        teacher_chunks = teacher_output.reshape(n_chunks, B, D)

        kernel = functools.partial(
            _distill_kernel, n_chunks=n_chunks, ncrops=self.ncrops,
            inv_student_temp=1.0 / self.student_temp)

        nrt = num_row_tiles  # captured by the index maps below

        per_row = pl.pallas_call(
            kernel,
            out_shape=jax.ShapeDtypeStruct((B, 1), jnp.float32),
            grid_spec=pltpu.PrefetchScalarGridSpec(
                num_scalar_prefetch=0,
                grid=(num_row_tiles, self.ncrops),
                in_specs=[
                    # 1/teacher_temp scalar in SMEM.
                    pl.BlockSpec(memory_space=pltpu.MemorySpace.SMEM),
                    # Student crop v, row tile r: each block streamed once.
                    pl.BlockSpec((row_tile, D),
                                 lambda r, v: (v * nrt + r, 0)),
                    # Teacher: all chunks of row tile r, resident across v.
                    pl.BlockSpec((n_chunks, row_tile, D),
                                 lambda r, v: (0, r, 0)),
                ],
                out_specs=pl.BlockSpec((row_tile, 1), lambda r, v: (r, 0)),
                scratch_shapes=[
                    pltpu.VMEM((n_chunks, row_tile, D), q_dtype),  # teacher q
                    pltpu.VMEM((row_tile, 1), jnp.float32),        # CE accum
                ],
            ),
            compiler_params=pltpu.CompilerParams(
                dimension_semantics=("parallel", "arbitrary"),
                vmem_limit_bytes=vmem_limit),
        )(inv_temp, student_output, teacher_chunks)

        # Tiny final reduction (mean over batch + /n_loss_terms) in plain JAX.
        return jnp.sum(per_row) / jnp.float32(B * n_terms)


def _reference(student_output, teacher_output, epoch, mod):
    """Pure-JAX reference mirroring the PyTorch forward (both ncrops paths)."""
    temp = float(mod.teacher_temp_schedule[epoch])
    student_out = student_output / mod.student_temp
    teacher_soft = jax.nn.softmax(teacher_output / temp, axis=-1)
    if mod.ncrops == 1:
        return jnp.mean(
            jnp.sum(-teacher_soft * jax.nn.log_softmax(student_out, axis=-1),
                    axis=-1))
    student_chunks = jnp.split(student_out, mod.ncrops, axis=0)
    teacher_chunks = jnp.split(teacher_soft, 2, axis=0)
    total = 0.0
    n = 0
    for q in teacher_chunks:
        for s in student_chunks:
            total = total + jnp.mean(
                jnp.sum(-q * jax.nn.log_softmax(s, axis=-1), axis=-1))
            n += 1
    return total / n


if __name__ == "__main__":
    key = jax.random.PRNGKey(0)
    k1, k2, k3, k4, k5, k6, k7, k8 = jax.random.split(key, 8)

    # Case 1: ncrops=2, B=8, D=128 (single row tile; merged teacher chunks).
    B, D, ncrops = 8, 128, 2
    student = jax.random.normal(k1, (ncrops * B, D), dtype=jnp.float32)
    teacher = jax.random.normal(k2, (2 * B, D), dtype=jnp.float32)
    mod = DistillLossV2(warmup_teacher_temp_epochs=5, nepochs=20, ncrops=ncrops)
    out = jax.block_until_ready(mod(student, teacher, epoch=3))
    ref = _reference(student, teacher, 3, mod)
    assert jnp.allclose(out, ref, atol=1e-3, rtol=1e-3), (out, ref)

    # Case 2: ncrops=3, B=16, D=256 -> row_tile=8 (two row tiles: exercises
    # the parallel row-tile axis and the teacher block resident across crops).
    B2, D2, ncrops2 = 16, 256, 3
    student2 = jax.random.normal(k3, (ncrops2 * B2, D2), dtype=jnp.float32)
    teacher2 = jax.random.normal(k4, (2 * B2, D2), dtype=jnp.float32)
    mod2 = DistillLossV2(warmup_teacher_temp_epochs=5, nepochs=20,
                         ncrops=ncrops2)
    out2 = jax.block_until_ready(mod2(student2, teacher2, epoch=10))
    ref2 = _reference(student2, teacher2, 10, mod2)
    assert jnp.allclose(out2, ref2, atol=1e-3, rtol=1e-3), (out2, ref2)

    # Case 3: ncrops=1 path (single teacher chunk, plain batch mean).
    B3, D3 = 8, 128
    student3 = jax.random.normal(k5, (B3, D3), dtype=jnp.float32)
    teacher3 = jax.random.normal(k6, (B3, D3), dtype=jnp.float32)
    mod3 = DistillLossV2(warmup_teacher_temp_epochs=5, nepochs=20, ncrops=1)
    out3 = jax.block_until_ready(mod3(student3, teacher3, epoch=0))
    ref3 = _reference(student3, teacher3, 0, mod3)
    assert jnp.allclose(out3, ref3, atol=1e-3, rtol=1e-3), (out3, ref3)

    # Case 4: bf16 inputs + bf16 cached teacher softmax (halved HBM/VMEM
    # traffic); reference uses the same bf16 values, looser tolerance for the
    # bf16 q-scratch rounding.
    B4, D4, ncrops4 = 16, 512, 2
    student4 = (0.3 * jax.random.normal(k7, (ncrops4 * B4, D4))
                ).astype(jnp.bfloat16)
    teacher4 = (0.3 * jax.random.normal(k8, (2 * B4, D4))).astype(jnp.bfloat16)
    mod4 = DistillLossV2(warmup_teacher_temp_epochs=5, nepochs=20,
                         ncrops=ncrops4)
    out4 = jax.block_until_ready(
        mod4(student4, teacher4, epoch=7, q_dtype=jnp.bfloat16))
    ref4 = _reference(student4.astype(jnp.float32),
                      teacher4.astype(jnp.float32), 7, mod4)
    assert jnp.allclose(out4, ref4, atol=2e-2, rtol=2e-2), (out4, ref4)

    print("KERNEL_OK")
</pallas_src>

<mosaic_0001>
module attributes {stable_mosaic.version = 11 : i64} {
  func.func @_distill_kernel(%arg0: i32, %arg1: i32, %arg2: memref<1xf32, #tpu.memory_space<smem>>, %arg3: memref<8x128xf32, #tpu.memory_space<vmem>>, %arg4: memref<2x8x128xf32, #tpu.memory_space<vmem>>, %arg5: memref<8x1xf32, #tpu.memory_space<vmem>>, %arg6: memref<2x8x128xf32, #tpu.memory_space<vmem>>, %arg7: memref<8x1xf32, #tpu.memory_space<vmem>>) attributes {dimension_semantics = [#tpu.dimension_semantics<parallel>, #tpu.dimension_semantics<arbitrary>], iteration_bounds = array<i64: 1, 2>, scalar_prefetch = 0 : i64, scratch_operands = 2 : i64, tpu.core_type = #tpu.core_type<tc>, window_params = [{transform_indices = @transform_0, window_bounds = array<i64: 1>}, {transform_indices = @transform_1, window_bounds = array<i64: 8, 128>}, {transform_indices = @transform_2, window_bounds = array<i64: 2, 8, 128>}, {transform_indices = @transform_3, window_bounds = array<i64: 8, 1>}]} {
    %c0_i32 = arith.constant 0 : i32
    %0 = arith.cmpi eq, %arg1, %c0_i32 : i32
    %1 = arith.extui %0 : i1 to i32
    %c0_i32_0 = arith.constant 0 : i32
    %2 = arith.cmpi ne, %1, %c0_i32_0 : i32
    scf.if %2 {
      %cst_17 = arith.constant 0.000000e+00 : f32
      %35 = vector.broadcast %cst_17 : f32 to vector<8x1xf32>
      %c0_18 = arith.constant 0 : index
      %c0_19 = arith.constant 0 : index
      %36 = vector.load %arg7[%c0_18, %c0_19] : memref<8x1xf32, #tpu.memory_space<vmem>>, vector<8x1xf32>
      tpu.vector_store %arg7[%c0_18, %c0_19], %35 {strides = array<i32>} : memref<8x1xf32, #tpu.memory_space<vmem>>, vector<8x1xf32>,
      %c0_20 = arith.constant 0 : index
      %c0_21 = arith.constant 0 : index
      %c0_22 = arith.constant 0 : index
      %37 = vector.load %arg4[%c0_20, %c0_21, %c0_22] : memref<2x8x128xf32, #tpu.memory_space<vmem>>, vector<2x8x128xf32>
      %c0_23 = arith.constant 0 : index
      %38 = memref.load %arg2[%c0_23] : memref<1xf32, #tpu.memory_space<smem>>
      %39 = vector.broadcast %38 : f32 to vector<2x8x128xf32>
      %40 = arith.mulf %37, %39 : vector<2x8x128xf32>
      %cst_24 = arith.constant dense<0xFF800000> : vector<2x8xf32>
      %41 = vector.multi_reduction <maximumf>, %40, %cst_24 [2] : vector<2x8x128xf32> to vector<2x8xf32>
      %42 = vector.shape_cast %41 : vector<2x8xf32> to vector<2x8x1xf32>
      %43 = vector.broadcast %42 : vector<2x8x1xf32> to vector<2x8x128xf32>
      %44 = arith.subf %40, %43 : vector<2x8x128xf32>
      %45 = math.exp %44 : vector<2x8x128xf32>
      %cst_25 = arith.constant dense<0.000000e+00> : vector<2x8xf32>
      %46 = vector.multi_reduction <add>, %45, %cst_25 [2] : vector<2x8x128xf32> to vector<2x8xf32>
      %47 = vector.shape_cast %46 : vector<2x8xf32> to vector<2x8x1xf32>
      %48 = tpu.reciprocal %47 {approx = true} : vector<2x8x1xf32> -> vector<2x8x1xf32>
      %49 = vector.broadcast %48 : vector<2x8x1xf32> to vector<2x8x128xf32>
      %50 = arith.mulf %45, %49 : vector<2x8x128xf32>
      %c0_26 = arith.constant 0 : index
      %c0_27 = arith.constant 0 : index
      %c0_28 = arith.constant 0 : index
      %51 = vector.load %arg6[%c0_26, %c0_27, %c0_28] : memref<2x8x128xf32, #tpu.memory_space<vmem>>, vector<2x8x128xf32>
      tpu.vector_store %arg6[%c0_26, %c0_27, %c0_28], %50 {strides = array<i32>} : memref<2x8x128xf32, #tpu.memory_space<vmem>>, vector<2x8x128xf32>,
    } else {
    }
    %c0 = arith.constant 0 : index
    %c0_1 = arith.constant 0 : index
    %3 = vector.load %arg3[%c0, %c0_1] : memref<8x128xf32, #tpu.memory_space<vmem>>, vector<8x128xf32>
    %cst = arith.constant 1.000000e+01 : f32
    %4 = vector.broadcast %cst : f32 to vector<8x128xf32>
    %5 = arith.mulf %3, %4 : vector<8x128xf32>
    %cst_2 = arith.constant dense<0xFF800000> : vector<8xf32>
    %6 = vector.multi_reduction <maximumf>, %5, %cst_2 [1] : vector<8x128xf32> to vector<8xf32>
    %7 = vector.shape_cast %6 : vector<8xf32> to vector<8x1xf32>
    %8 = vector.broadcast %7 : vector<8x1xf32> to vector<8x128xf32>
    %9 = arith.subf %5, %8 : vector<8x128xf32>
    %10 = math.exp %9 : vector<8x128xf32>
    %cst_3 = arith.constant dense<0.000000e+00> : vector<8xf32>
    %11 = vector.multi_reduction <add>, %10, %cst_3 [1] : vector<8x128xf32> to vector<8xf32>
    %12 = vector.shape_cast %11 : vector<8xf32> to vector<8x1xf32>
    %13 = math.log %12 : vector<8x1xf32>
    %14 = arith.addf %7, %13 : vector<8x1xf32>
    %cst_4 = arith.constant 2.000000e+00 : f32
    %15 = vector.broadcast %cst_4 : f32 to vector<8x1xf32>
    %16 = arith.mulf %15, %14 : vector<8x1xf32>
    %c0_5 = arith.constant 0 : index
    %c0_6 = arith.constant 0 : index
    %c0_7 = arith.constant 0 : index
    %17 = vector.load %arg6[%c0_5, %c0_6, %c0_7] : memref<2x8x128xf32, #tpu.memory_space<vmem>>, vector<1x8x128xf32>
    %18 = vector.shape_cast %17 : vector<1x8x128xf32> to vector<8x128xf32>
    %19 = arith.mulf %18, %5 : vector<8x128xf32>
    %cst_8 = arith.constant dense<0.000000e+00> : vector<8xf32>
    %20 = vector.multi_reduction <add>, %19, %cst_8 [1] : vector<8x128xf32> to vector<8xf32>
    %21 = vector.shape_cast %20 : vector<8xf32> to vector<8x1xf32>
    %22 = arith.subf %16, %21 : vector<8x1xf32>
    %c1 = arith.constant 1 : index
    %c0_9 = arith.constant 0 : index
    %c0_10 = arith.constant 0 : index
    %23 = vector.load %arg6[%c1, %c0_9, %c0_10] : memref<2x8x128xf32, #tpu.memory_space<vmem>>, vector<1x8x128xf32>
    %24 = vector.shape_cast %23 : vector<1x8x128xf32> to vector<8x128xf32>
    %25 = arith.mulf %24, %5 : vector<8x128xf32>
    %cst_11 = arith.constant dense<0.000000e+00> : vector<8xf32>
    %26 = vector.multi_reduction <add>, %25, %cst_11 [1] : vector<8x128xf32> to vector<8xf32>
    %27 = vector.shape_cast %26 : vector<8xf32> to vector<8x1xf32>
    %28 = arith.subf %22, %27 : vector<8x1xf32>
    %c0_12 = arith.constant 0 : index
    %c0_13 = arith.constant 0 : index
    %29 = vector.load %arg7[%c0_12, %c0_13] : memref<8x1xf32, #tpu.memory_space<vmem>>, vector<8x1xf32>
    %30 = arith.addf %29, %28 : vector<8x1xf32>
    %c0_14 = arith.constant 0 : index
    %c0_15 = arith.constant 0 : index
    %31 = vector.load %arg7[%c0_14, %c0_15] : memref<8x1xf32, #tpu.memory_space<vmem>>, vector<8x1xf32>
    tpu.vector_store %arg7[%c0_14, %c0_15], %30 {strides = array<i32>} : memref<8x1xf32, #tpu.memory_space<vmem>>, vector<8x1xf32>,
    %c1_i32 = arith.constant 1 : i32
    %32 = arith.cmpi eq, %arg1, %c1_i32 : i32
    %33 = arith.extui %32 : i1 to i32
    %c0_i32_16 = arith.constant 0 : i32
    %34 = arith.cmpi ne, %33, %c0_i32_16 : i32
    scf.if %34 {
      %c0_17 = arith.constant 0 : index
      %c0_18 = arith.constant 0 : index
      %35 = vector.load %arg7[%c0_17, %c0_18] : memref<8x1xf32, #tpu.memory_space<vmem>>, vector<8x1xf32>
      %c0_19 = arith.constant 0 : index
      %c0_20 = arith.constant 0 : index
      %36 = vector.load %arg5[%c0_19, %c0_20] : memref<8x1xf32, #tpu.memory_space<vmem>>, vector<8x1xf32>
      tpu.vector_store %arg5[%c0_19, %c0_20], %35 {strides = array<i32>} : memref<8x1xf32, #tpu.memory_space<vmem>>, vector<8x1xf32>,
    } else {
    }
    return
  }
  func.func @transform_0(%arg0: i32, %arg1: i32) -> i32 {
    %c0_i32 = arith.constant 0 : i32
    %c0_i32_0 = arith.constant 0 : i32
    return %c0_i32 : i32
  }
  func.func @transform_1(%arg0: i32, %arg1: i32) -> (i32, i32) {
    %c1_i32 = arith.constant 1 : i32
    %0 = arith.muli %arg1, %c1_i32 : i32
    %1 = arith.addi %0, %arg0 : i32
    %c0_i32 = arith.constant 0 : i32
    %c0_i32_0 = arith.constant 0 : i32
    return %1, %c0_i32 : i32, i32
  }
  func.func @transform_2(%arg0: i32, %arg1: i32) -> (i32, i32, i32) {
    %c0_i32 = arith.constant 0 : i32
    %c0_i32_0 = arith.constant 0 : i32
    %c0_i32_1 = arith.constant 0 : i32
    return %c0_i32, %arg0, %c0_i32_0 : i32, i32, i32
  }
  func.func @transform_3(%arg0: i32, %arg1: i32) -> (i32, i32) {
    %c0_i32 = arith.constant 0 : i32
    %c0_i32_0 = arith.constant 0 : i32
    return %arg0, %c0_i32 : i32, i32
  }
}

</mosaic_0001>

<bundles_post_ra>
// kernel: tpu_custom_call.1
= control target key start
LH: loop header
LB: loop body
LE: loop exit
PB: predicated region body
PF: predicated region fallthrough
CT: control target
= control target key end

     0   :  { %s771_s0 = inlined_call_operand.<no memory space> [shape: f32[1], index: 0, kind: input, shape index: {}]   ;;  %s772_s1 = inlined_call_operand.hbm [shape: f32[16,128], index: 1, kind: input, shape index: {}]   ;;  %s773_s2 = inlined_call_operand.hbm [shape: f32[2,8,128], index: 2, kind: input, shape index: {}]   ;;  %s774_s3 = inlined_call_operand.vmem [shape: f32[8,1], index: 3, kind: output, shape index: {}]  }
   0x1   :  { %8 = sst [smem:[#allocation4]] %s771_s0 }
   0x2   :  { %9 = vsyncpa [#allocation6], 0 }
   0x3   :  { %11 = vsyncpa [#allocation6 + $0x1], 0 }
   0x4   :  { %12 = vsyncpa [#allocation8], 0  ;;  %s611_s14 = smov 0   ;;  %s613_s15 = smov 0  }
   0x5   :  { %s615_s16 = smov 0   ;;  %s617_s17 = smov 0  }
   0x6   :  { %s619_s18 = smov 0   ;;  %s621_s19 = smov 0  }
   0x7 LB: > { %s374_s0 = sadd.s32 4294967295, %s581_s19   ;;  %p73_p0 = scmp.ne.s32.totalorder %s565_s15, %s561_s14  ;;  %s581_s19 = sphi %s621_s19, %s18_s19   ;;  %s577_s18 = sphi %s619_s18, %s791_s18   ;;  %s573_s17 = sphi %s617_s17, %s790_s17   ;;  %s569_s16 = sphi %s615_s16, %s789_s16   ;;  %s565_s15 = sphi %s613_s15, %s788_s15   ;;  %s561_s14 = sphi %s611_s14, %s787_s14  }
   0x8   : > { %p641_p1 = scmp.eq.s32.totalorder %s374_s0, 0  ;;  %p375_p2 = scmp.ge.s32.totalorder %s581_s19, 1 }
   0x9   : > { %p136_p3 = scmp.lt.s32.totalorder %s581_s19, 3  ;;  %s583_s23 = smov [#allocation7]  }
   0xa   : > { %s779_s20 = scalar_select %p641_p1, 1, 0 }
   0xb   : > { %p649_p4 = por %p641_p1, %p73_p0  ;;  %p653_p5 = pnand %p375_p2, %p136_p3 }
   0xc   : > { %s153_s24 = sshll.u32 %s583_s23, 4  ;;  %s27_s26 = sadd.s32 1, %s577_s18  ;;  %s154_s24 = int_to_ptr.vmem [resolvable:$true] %s153_s24 }
   0xd   : > { %s780_s21 = scalar_select %p649_p4, 1, 0 }
   0xe   : > { %s781_s22 = scalar_select %p653_p5, 1, 0 }
   0xf   : > { %p394_p6 = pneg %p653_p5  ;;  %s469_s29 = scalar_lea.hbm %s773_s2, 256 }
  0x10   : > { %p470_p8 = scmp.ne.s32.totalorder %s773_s2, %s469_s29  ;;  %p476_p12 = scmp.lt.u32.totalorder %s469_s29, %s773_s2 }
  0x11   : > { %p661_p7 = pnand %p394_p6, %p641_p1 }
  0x13   : > { %p471_p9 = pneg %p661_p7 }
  0x15   : > { %p472_p10 = pnand %p471_p9, %p470_p8 }
  0x17   : > { %p473_p11 = pneg %p472_p10 }
  0x19   : > { %p478_p13 = pnand %p476_p12, %p473_p11 }
  0x1b   : > { %481 = shalt.err (!%p478_p13)
}
  0x1c   : > { %s482_s7 = scalar_lea.vmem %s154_s24, 256  ;;  %p490_p6 = scmp.lt.s32.totalorder %s154_s24, %s154_s24 }
  0x1d   : > { %p483_p0 = scmp.ne.s32.totalorder %s154_s24, %s482_s7  ;;  %p491_p1 = scmp.lt.s32.totalorder %s482_s7, %s482_s7 }
  0x1f   : > { %p485_p2 = pnand %p483_p0, %p471_p9  ;;  %p492_p4 = por %p491_p1, %p490_p6 }
  0x21   : > { %p486_p3 = pneg %p485_p2 }
  0x23   : > { %p493_p5 = pnand %p492_p4, %p486_p3 }
  0x25   : > { %496 = shalt.err (!%p493_p5)
}
  0x26   : > { %s584_s8 = smov 128   ;;  %s585_s9 = smov 8  }
  0x27   : > { %397 = dma.hbm_to_vmem [thread:$0]  (!%p661_p7), %s773_s2, 256, %s154_s24, [#allocation8], %s584_s8, %s584_s8, %s585_s9  }
  0x28   : > { %p28_p1 = scmp.ge.s32.totalorder %s27_s26, 2  ;;  %s60_s12 = sadd.s32 1, %s569_s16 }
  0x29   : > { %p67_p4 = scmp.ne.s32.totalorder %s569_s16, %s565_s15  ;;  %p68_p5 = scmp.eq.s32.totalorder %s581_s19, 0 }
  0x2a   : > { %s793_s26 = smov (%p28_p1, %s27_s26), 0  ;;  %p403_p9 = scmp.lt.s32.totalorder %s581_s19, 2 }
  0x2b   : > { %p69_p8 = por %p68_p5, %p67_p4  ;;  %s57_s13 = ssub.s32 %s577_s18, %s793_s26 }
  0x2c   : > { %s167_s14 = sand.u32 1, %s569_s16   ;;  %p58_p10 = scmp.eq.s32.totalorder %s57_s13, 0 }
  0x2d   : > { %s378_s0 = sshll.u32 %s167_s14, 3  ;;  %s379_s23 = sshll.u32 %s577_s18, 7 }
  0x2e   : > { %s694_s27 = scalar_select %p58_p10, %s569_s16, %s60_s12  }
  0x2f   : > { %s699_s24 = scalar_lea.hbm %s772_s1, %s379_s23  ;;  %s171_s29 = scalar_lea.vmem [#allocation5], %s378_s0 }
  0x30   : > { %s179_s30 = sshll.u32 %s171_s29, 4  ;;  %p701_p7 = pnand %p403_p9, %p69_p8  ;;  %s705_s30 = int_to_ptr.vmem [resolvable:$true] %s179_s30 }
  0x31   : > { %s168_s5 = scalar_lea.sflag [#allocation6], %s167_s14  ;;  %s497_s6 = scalar_lea.hbm %s699_s24, 128 }
  0x32   : > { %p498_p11 = scmp.ne.s32.totalorder %s699_s24, %s497_s6  ;;  %p499_p12 = pneg %p701_p7 }
  0x33   : > { %s502_s9 = scalar_lea.hbm %s772_s1, 256  ;;  %p503_p2 = scmp.lt.u32.totalorder %s699_s24, %s772_s1 }
  0x34   : > { %p500_p13 = pnand %p499_p12, %p498_p11  ;;  %p504_p3 = scmp.lt.u32.totalorder %s502_s9, %s497_s6 }
  0x35   : > { %p506_p1 = scmp.lt.u32.totalorder %s497_s6, %s699_s24 }
  0x36   : > { %p501_p0 = pneg %p500_p13  ;;  %p505_p6 = por %p504_p3, %p503_p2 }
  0x38   : > { %p507_p4 = por %p506_p1, %p505_p6 }
  0x3a   : > { %p508_p5 = pnand %p507_p4, %p501_p0 }
  0x3c   : > { %511 = shalt.err (!%p508_p5)
}
  0x3d   : > { %s512_s12 = scalar_lea.vmem %s705_s30, 128  ;;  %s586_s13 = smov [#allocation5]  }
  0x3e   : > { %p513_p8 = scmp.ne.s32.totalorder %s705_s30, %s512_s12  ;;  %s517_s14 = sshll.u32 %s586_s13, 4  ;;  %s518_s14 = int_to_ptr.vmem [resolvable:$false] %s517_s14 }
  0x3f   : > { %s519_s0 = scalar_lea.vmem %s518_s14, 256  ;;  %p520_p11 = scmp.lt.s32.totalorder %s705_s30, %s518_s14 }
  0x40   : > { %p515_p9 = pnand %p513_p8, %p499_p12  ;;  %p521_p13 = scmp.lt.s32.totalorder %s519_s0, %s512_s12 }
  0x42   : > { %p516_p10 = pneg %p515_p9  ;;  %p522_p2 = por %p521_p13, %p520_p11 }
  0x44   : > { %p523_p3 = pnand %p522_p2, %p516_p10 }
  0x46   : > { %526 = shalt.err (!%p523_p3)
}
  0x47   : > { %401 = dma.hbm_to_vmem [thread:$0]  (!%p701_p7), %s699_s24, 128, %s705_s30, %s168_s5  }
  0x48   : > { %p784_p0 = scmp.ne.s32.totalorder %s781_s22, 0 }
  0x49   : > { %s190_s23 = sand.u32 (!%p784_p0), 1, %s565_s15   ;;  %p785_p12 = scmp.ne.s32.totalorder (!%p784_p0), %s780_s21, 0 }
  0x4a   : > { %188 = sbr.rel (%p784_p0) target bundleno = 746 (0x2ea), region = 32  ;;  %s735_s25 = sshll.u32 (!%p784_p0), %s190_s23, 3 }
  0x4b   : > { %s191_s28 = scalar_lea.sflag (!%p784_p0), [#allocation6], %s190_s23  ;;  %s194_s29 = scalar_lea.vmem (!%p784_p0), [#allocation5], %s735_s25 }
  0x51   : > { %552 = dma.done.wait (%p785_p12), %s191_s28, 128  }
  0x52   : > { %554 = vsyncadd (%p785_p12), %s191_s28, 4294967168  ;;  %p786_p6 = scmp.ne.s32.totalorder %s779_s20, 0 }
  0x54   : > { %556 = dma.done.wait (%p786_p6), [#allocation8], 256  }
  0x55   : > { %558 = vsyncadd (%p786_p6), [#allocation8], 4294967040  ;;  %p383_p7 = scmp.ne.s32.totalorder %s573_s17, 0 }
  0x56   : > { %s233_s22 = sld [smem:[#allocation4]] (!%p383_p7)  ;;  %v231_v0 = vld [vmem:[#allocation7] sm:$0xff] (!%p383_p7)  ;;  %v232_v2 = vld [vmem:[#allocation7 + $0x8] sm:$0xff] (!%p383_p7)  ;;  %vm229_vm0 = vcmask (!%p383_p7), 7168   ;;  %v587_v13 = vmov (!%p383_p7), 0.0  }
  0x57   : > { %228 = sbr.rel (%p383_p7) target bundleno = 412 (0x19c), region = 44  ;;  %230 = vst.msk [vmem:[#allocation3] sm:$0xff] (!%p383_p7), %vm229_vm0, %v587_v13 }
  0x5c   : > { %v234_v1 = vstv (!%p383_p7), %s233_s22 }
  0x5d   : > { %v235_v3 = vmul.f32 (!%p383_p7), %v234_v1, %v231_v0  ;;  %v236_v4 = vmul.f32 (!%p383_p7), %v234_v1, %v232_v2 }
  0x5f   : > { %237 = vmax.xlane.f32.xlu0 %v235_v3 }
  0x63   : > { %239 = vmax.xlane.f32.xlu0 %v236_v4 }
  0xec   : > { %v238_v5 = vpop.xlane.xlu0 %237 }
  0xed   : > { %v241_v6 = vsub.f32 %v235_v3, %v238_v5 }
  0xef   : > { %v243_v7 = vmul.f32 1.442695, %v241_v6 }
  0xf0   : > { %v240_v8 = vpop.xlane.xlu0 %239 }
  0xf1   : > { %457 = vpow2.f32 %v243_v7  ;;  %v242_v9 = vsub.f32 %v236_v4, %v240_v8 }
  0xf3   : > { %v245_v10 = vmul.f32 1.442695, %v242_v9 }
  0xf5   : > { %459 = vpow2.f32 %v245_v10 }
  0xfb   : > { %v458_v11 = vpop.eup %457 }
  0xfc   : > { %247 = vadd.xlane.f32.xlu1 %v458_v11 }
  0xff   : > { %v460_v12 = vpop.eup %459 }
 0x100   : > { %249 = vadd.xlane.f32.xlu1 %v460_v12 }
 0x189   : > { %v248_v14 = vpop.xlane.xlu1 %247 }
 0x18a   : > { %461 = vrcp.f32 %v248_v14 }
 0x18d   : > { %v250_v15 = vpop.xlane.xlu1 %249 }
 0x18e   : > { %463 = vrcp.f32 %v250_v15 }
 0x194   : > { %v462_v16 = vpop.eup %461 }
 0x195   : > { %v253_v17 = vmul.f32 %v462_v16, %v458_v11 }
 0x197   : > { %255 = vst [vmem:[#allocation2] sm:$0xff] %v253_v17 }
 0x198   : > { %v464_v18 = vpop.eup %463 }
 0x199   : > { %v254_v19 = vmul.f32 %v464_v18, %v460_v12 }
 0x19b   : > { %256 = vst [vmem:[#allocation2 + $0x8] sm:$0xff] %v254_v19 }
 0x19c PF: > { %v257_v20 = vld [vmem:[%s194_s29] sm:$0xff]  ;;  %v281_v38 = vld [vmem:[#allocation3] sm:$0xff]  ;;  %vm283_vm1 = vcmask 7168   ;;  %p384_p1 = scmp.ne.s32.totalorder %s573_s17, 1 }
 0x19d   : > { %v258_v21 = vmul.f32 10.0, %v257_v20 }
 0x19e   : > { %v270_v22 = vld [vmem:[#allocation2] sm:$0xff] }
 0x19f   : > { %259 = vmax.xlane.f32.xlu0 %v258_v21  ;;  %v271_v24 = vmul.f32 %v270_v22, %v258_v21 }
 0x1a1   : > { %272 = vadd.xlane.f32.xlu1 %v271_v24 }
 0x1a2   : > { %v276_v23 = vld [vmem:[#allocation2 + $0x8] sm:$0xff] }
 0x1a3   : > { %v277_v25 = vmul.f32 %v276_v23, %v258_v21 }
 0x1a5   : > { %278 = vadd.xlane.f32.xlu1 %v277_v25 }
 0x22c   : > { %v260_v26 = vpop.xlane.xlu0 %259 }
 0x22d   : > { %v261_v27 = vsub.f32 %v258_v21, %v260_v26 }
 0x22e   : > { %v273_v32 = vpop.xlane.xlu1 %272 }
 0x22f   : > { %v262_v28 = vmul.f32 1.442695, %v261_v27 }
 0x231   : > { %465 = vpow2.f32 %v262_v28 }
 0x232   : > { %v279_v36 = vpop.xlane.xlu1 %278 }
 0x23b   : > { %v466_v29 = vpop.eup %465 }
 0x23c   : > { %264 = vadd.xlane.f32.xlu0 %v466_v29 }
 0x2c9   : > { %v265_v30 = vpop.xlane.xlu0 %264 }
 0x2ca   : > { %467 = vlog2.f32 %v265_v30 }
 0x2d4   : > { %v468_v31 = vpop.eup %467 }
 0x2d5   : > { %v267_v33 = vmul.f32 0.6931472, %v468_v31 }
 0x2d7   : > { %v268_v34 = vadd.f32 %v267_v33, %v260_v26 }
 0x2d9   : > { %v269_v35 = vmul.f32 2.0, %v268_v34 }
 0x2db   : > { %v274_v37 = vsub.f32 %v269_v35, %v273_v32  ;;  %288 = sbr.rel (%p384_p1) target bundleno = 746 (0x2ea), region = 48 }
 0x2dd   : > { %v280_v39 = vsub.f32 %v274_v37, %v279_v36 }
 0x2df   : > { %v282_v40 = vadd.f32 %v281_v38, %v280_v39 }
 0x2e1   : > { %284 = vst.msk [vmem:[#allocation3] sm:$0xff] %vm283_vm1, %v282_v40 }
 0x2e8   : > { %v289_v41 = vld [vmem:[#allocation3] sm:$0xff] }
 0x2e9   : > { %290 = vst.msk [vmem:[%s774_s3] sm:$0xff] %vm283_vm1, %v289_v41 }
 0x2ea PF: > { %s18_s19 = sadd.s32 1, %s581_s19   ;;  %s787_s14 = smov %s565_s15 }
 0x2eb   : > { %p15_p4 = scmp.ge.s32.totalorder %s18_s19, 4   ;;  %s788_s15 = smov %s569_s16 }
 0x2ec   : > { %s789_s16 = smov %s694_s27  ;;  %s790_s17 = smov %s577_s18 }
 0x2ed   : > { %s791_s18 = smov %s793_s26  ;;  %17 = sbr.rel (!%p15_p4) target bundleno = 7 (0x7), region = 86 }
 0x2f4   :  { %310 = vsyncpa [#allocation6], 1 }
 0x2f5   :  { %312 = vsyncpa [#allocation6 + $0x1], 1 }
 0x2f6   :  { %313 = vsyncpa [#allocation8], 1 }

</bundles_post_ra>
